<compile_context>
chip_gen: v5e
topology: v5e:2x2
jax: 0.10.0
libtpu: 0.0.40
codegen_flags: <defaults>
</compile_context>

<pallas_src>
import jax
import jax.numpy as jnp
from jax.experimental import pallas as pl
from jax.experimental.pallas import tpu as pltpu


# ----------------------------- Pallas kernel ------------------------------- #
def _attention_kernel(h1_ref, h2_ref, lab_ref,
                      w1a_ref, w1b_ref, b1_ref, w2_ref, b2_ref,
                      rg1_ref, rg2_ref, bg_ref,
                      woa_ref, wob_ref, bo_ref,
                      pred_ref):
    f32 = jnp.float32
    Bt, T, H = h1_ref.shape
    C = lab_ref.shape[0]

    h1 = h1_ref[...]                                   # (Bt, T, H)  bf16
    h2 = h2_ref[...]                                   # (Bt, T, H)  bf16
    lab = lab_ref[...]                                 # (C, H)      bf16
    cdt = h1.dtype

    h1_2d = h1.reshape(Bt * T, H)
    h2_2d = h2.reshape(Bt * T, H)

    # ---- self-attention scores: tanh(linear_first) -> linear_second --------
    # batch folded into M (M = Bt*T); linear_first split over the two H halves
    s = jnp.tanh(
        jnp.dot(h1_2d, w1a_ref[...], preferred_element_type=f32)
        + jnp.dot(h2_2d, w1b_ref[...], preferred_element_type=f32)
        + b1_ref[...])                                               # (Bt*T, d_a) f32
    att = (jnp.dot(s.astype(cdt), w2_ref[...], preferred_element_type=f32)
           + b2_ref[...])                                            # (Bt*T, C)  f32
    att = att.reshape(Bt, T, C)

    # softmax over time (dim=1); divide on the EUP
    att = att - jnp.max(att, axis=1, keepdims=True)
    e = jnp.exp(att)
    p = e * pl.reciprocal(jnp.sum(e, axis=1, keepdims=True), approx=True)
    p_t = jnp.swapaxes(p, 1, 2).astype(cdt)                          # (Bt, C, T)

    # ---- label-attention scores, per H half ---------------------------------
    # m = label @ h^T computed as a minor-dim contraction (no h transpose)
    dn = (((1,), (1,)), ((), ()))                                    # contract H with H
    m1 = jax.lax.dot_general(h1_2d, lab, dn, preferred_element_type=f32)   # (Bt*T, C)
    m2 = jax.lax.dot_general(h2_2d, lab, dn, preferred_element_type=f32)
    m1_t = jnp.swapaxes(m1.reshape(Bt, T, C), 1, 2).astype(cdt)      # (Bt, C, T)
    m2_t = jnp.swapaxes(m2.reshape(Bt, T, C), 1, 2).astype(cdt)

    # ---- contract time once per half on the stacked [label; self] maps ------
    # rows [0:C) = label attention, rows [C:2C) = self attention
    S1 = jnp.concatenate([m1_t, p_t], axis=1)                        # (Bt, 2C, T)
    S2 = jnp.concatenate([m2_t, p_t], axis=1)
    L1 = jnp.einsum('bct,bth->bch', S1, h1, preferred_element_type=f32)  # (Bt, 2C, H)
    L2 = jnp.einsum('bct,bth->bch', S2, h2, preferred_element_type=f32)

    la1, sa1 = L1[:, :C], L1[:, C:]                                  # (Bt, C, H) f32
    la2, sa2 = L2[:, :C], L2[:, C:]

    # ---- fused adaptive gating: 2-column RHS per half on the stacked LHS ----
    # col 0 = weight1 (label path), col 1 = weight2 (self path)
    G = (jnp.dot(L1.reshape(Bt * 2 * C, H).astype(cdt), rg1_ref[...],
                 preferred_element_type=f32)
         + jnp.dot(L2.reshape(Bt * 2 * C, H).astype(cdt), rg2_ref[...],
                   preferred_element_type=f32))
    G = G.reshape(Bt, 2 * C, 2)
    w1 = jax.nn.sigmoid(G[:, :C, 0:1] + bg_ref[0])                   # (Bt, C, 1)
    w2 = jax.nn.sigmoid(G[:, C:, 1:2] + bg_ref[1])
    w1n = w1 * pl.reciprocal(w1 + w2, approx=True)
    w2n = 1.0 - w1n

    # ---- doc + class-average pooling, per half (no 2H-wide concat) ----------
    inv_c = 1.0 / C
    avg1 = jnp.sum(w1n * la1 + w2n * sa1, axis=1) * inv_c            # (Bt, H) f32
    avg2 = jnp.sum(w1n * la2 + w2n * sa2, axis=1) * inv_c

    # ---- output layer: lane-dense (class dim padded to 128 by the wrapper) --
    logits = (jnp.dot(avg1.astype(cdt), woa_ref[...], preferred_element_type=f32)
              + jnp.dot(avg2.astype(cdt), wob_ref[...], preferred_element_type=f32)
              + bo_ref[...])                                         # (Bt, Cp) f32
    pred_ref[...] = jax.nn.sigmoid(logits)


def attention_pallas(outputs, label, W1, b1, W2, b2, Wg1, bg1, Wg2, bg2, Wo, bo,
                     *, batch_tile=8):
    """outputs: (B, T, 2H) f32 LSTM states; weights pre-transposed to (in, out)."""
    B, T, C2H = outputs.shape
    C, H = label.shape
    d_a = W1.shape[1]
    assert C2H == 2 * H

    # batch tile: whole batch in one program unless B is large (v7x megacore
    # wants >1 parallel grid steps); Bt must divide B.
    Bt = batch_tile if (batch_tile < B and B % batch_tile == 0) else B
    nb = B // Bt

    cdt = jnp.bfloat16                  # MXU operand dtype; accumulation is f32
    f32 = jnp.float32
    Cp = 128 * pl.cdiv(C, 128)          # lane-dense class dim for the output

    # split the 2H axis into forward/backward halves outside the kernel
    h1 = outputs[..., :H].astype(cdt)
    h2 = outputs[..., H:].astype(cdt)
    lab = label.astype(cdt)

    W1a, W1b = W1[:H].astype(cdt), W1[H:].astype(cdt)
    W2c = W2.astype(cdt)
    # fused gate weights: col 0 = weight1, col 1 = weight2, split per H half
    Rg1 = jnp.concatenate([Wg1[:H], Wg2[:H]], axis=1).astype(cdt)    # (H, 2)
    Rg2 = jnp.concatenate([Wg1[H:], Wg2[H:]], axis=1).astype(cdt)    # (H, 2)
    bg = jnp.concatenate([bg1.reshape(-1), bg2.reshape(-1)]).astype(f32)  # (2,) -> SMEM
    # output layer split per half + zero-padded to Cp lanes
    WoA = jnp.zeros((H, Cp), cdt).at[:, :C].set(Wo[:H].astype(cdt))
    WoB = jnp.zeros((H, Cp), cdt).at[:, :C].set(Wo[H:].astype(cdt))
    bo_p = jnp.zeros((1, Cp), f32).at[:, :C].set(bo.astype(f32))
    b1f, b2f = b1.astype(f32), b2.astype(f32)

    in_specs = [
        pl.BlockSpec((Bt, T, H), lambda i: (i, 0, 0)),   # h1 (forward states)
        pl.BlockSpec((Bt, T, H), lambda i: (i, 0, 0)),   # h2 (backward states)
        pl.BlockSpec((C, H),     lambda i: (0, 0)),      # label embedding
        pl.BlockSpec((H, d_a),   lambda i: (0, 0)),      # linear_first  W^T[:H]
        pl.BlockSpec((H, d_a),   lambda i: (0, 0)),      # linear_first  W^T[H:]
        pl.BlockSpec((1, d_a),   lambda i: (0, 0)),      # linear_first  b
        pl.BlockSpec((d_a, C),   lambda i: (0, 0)),      # linear_second W^T
        pl.BlockSpec((1, C),     lambda i: (0, 0)),      # linear_second b
        pl.BlockSpec((H, 2),     lambda i: (0, 0)),      # fused gate W, half 1
        pl.BlockSpec((H, 2),     lambda i: (0, 0)),      # fused gate W, half 2
        pl.BlockSpec(memory_space=pltpu.MemorySpace.SMEM),  # gate biases (2,)
        pl.BlockSpec((H, Cp),    lambda i: (0, 0)),      # output W^T[:H], padded
        pl.BlockSpec((H, Cp),    lambda i: (0, 0)),      # output W^T[H:], padded
        pl.BlockSpec((1, Cp),    lambda i: (0, 0)),      # output b, padded
    ]
    out_specs = pl.BlockSpec((Bt, Cp), lambda i: (i, 0))

    pred_pad = pl.pallas_call(
        _attention_kernel,
        out_shape=jax.ShapeDtypeStruct((B, Cp), f32),
        grid=(nb,),
        in_specs=in_specs,
        out_specs=out_specs,
        compiler_params=pltpu.CompilerParams(dimension_semantics=("parallel",)),
    )(h1, h2, lab, W1a, W1b, b1f, W2c, b2f, Rg1, Rg2, bg, WoA, WoB, bo_p)

    return pred_pad[:, :C]


# --------------------------- plain-JAX glue --------------------------------- #
def lstm_bidirectional(x, h0, c0, params):
    """PyTorch-semantics 1-layer bidirectional LSTM. x: (B, T, E) -> (B, T, 2H)."""
    Wih_f, Whh_f, b_f, Wih_b, Whh_b, b_b = params

    def make_step(Wih, Whh, b):
        def step(carry, x_t):
            h, c = carry
            gates = x_t @ Wih.T + h @ Whh.T + b           # (B, 4H), gate order i,f,g,o
            i, f, g, o = jnp.split(gates, 4, axis=-1)
            i = jax.nn.sigmoid(i)
            f = jax.nn.sigmoid(f)
            g = jnp.tanh(g)
            o = jax.nn.sigmoid(o)
            c = f * c + i * g
            h = o * jnp.tanh(c)
            return (h, c), h
        return step

    xt = jnp.swapaxes(x, 0, 1)                            # (T, B, E)
    _, hs_f = jax.lax.scan(make_step(Wih_f, Whh_f, b_f), (h0[0], c0[0]), xt)
    _, hs_b = jax.lax.scan(make_step(Wih_b, Whh_b, b_b), (h0[1], c0[1]), xt[::-1])
    hs_b = hs_b[::-1]
    out = jnp.concatenate([hs_f, hs_b], axis=-1)          # (T, B, 2H)
    return jnp.swapaxes(out, 0, 1)                        # (B, T, 2H)


def forward_reference(outputs, label, W1, b1, W2, b2, Wg1, bg1, Wg2, bg2, Wo, bo,
                      n_classes, H):
    """Pure-JAX f32 reference of the attention part (mirrors the PyTorch math)."""
    s = jnp.tanh(outputs @ W1 + b1)
    att = s @ W2 + b2
    att = jax.nn.softmax(att, axis=1)
    self_att = jnp.swapaxes(att, 1, 2) @ outputs
    h1 = outputs[..., :H]
    h2 = outputs[..., H:]
    m1 = jnp.einsum('ch,bth->bct', label, h1)
    m2 = jnp.einsum('ch,bth->bct', label, h2)
    label_att = jnp.concatenate([m1 @ h1, m2 @ h2], axis=2)
    w1 = jax.nn.sigmoid(label_att @ Wg1 + bg1)
    w2 = jax.nn.sigmoid(self_att @ Wg2 + bg2)
    w1n = w1 / (w1 + w2)
    w2n = 1.0 - w1n
    doc = w1n * label_att + w2n * self_att
    avg = jnp.sum(doc, axis=1) / n_classes
    return jax.nn.sigmoid(avg @ Wo + bo)


# ---------------------------------- main ------------------------------------ #
if __name__ == "__main__":
    key = jax.random.PRNGKey(0)
    B, T, V, E = 2, 8, 50, 300          # batch, seq, vocab, embedding dim (LSTM input = 300)
    H, d_a, C = 32, 16, 4               # lstm_hid_dim, d_a, n_classes

    keys = jax.random.split(key, 21)
    emb_table   = jax.random.normal(keys[0],  (V, E), jnp.float32) * 0.1
    label_embed = jax.random.normal(keys[1],  (C, H), jnp.float32) * 0.1

    # LSTM params (PyTorch layout: weight_ih (4H, E), weight_hh (4H, H), combined bias)
    Wih_f = jax.random.normal(keys[2], (4 * H, E), jnp.float32) * 0.05
    Whh_f = jax.random.normal(keys[3], (4 * H, H), jnp.float32) * 0.05
    b_f   = jax.random.normal(keys[4], (4 * H,),   jnp.float32) * 0.05
    Wih_b = jax.random.normal(keys[5], (4 * H, E), jnp.float32) * 0.05
    Whh_b = jax.random.normal(keys[6], (4 * H, H), jnp.float32) * 0.05
    b_b   = jax.random.normal(keys[7], (4 * H,),   jnp.float32) * 0.05

    # Linear layers, stored pre-transposed to (in, out); biases as (1, out)
    W1  = jax.random.normal(keys[8],  (2 * H, d_a), jnp.float32) * 0.1
    b1  = jax.random.normal(keys[9],  (1, d_a),     jnp.float32) * 0.1
    W2  = jax.random.normal(keys[10], (d_a, C),     jnp.float32) * 0.1
    b2  = jax.random.normal(keys[11], (1, C),       jnp.float32) * 0.1
    Wg1 = jax.random.normal(keys[12], (2 * H, 1),   jnp.float32) * 0.1
    bg1 = jax.random.normal(keys[13], (1, 1),       jnp.float32) * 0.1
    Wg2 = jax.random.normal(keys[14], (2 * H, 1),   jnp.float32) * 0.1
    bg2 = jax.random.normal(keys[15], (1, 1),       jnp.float32) * 0.1
    Wo  = jax.random.normal(keys[16], (2 * H, C),   jnp.float32) * 0.1
    bo  = jax.random.normal(keys[17], (1, C),       jnp.float32) * 0.1

    # token ids and deterministic h0/c0 (stand-in for init_hidden's torch.randn)
    x  = jax.random.randint(keys[18], (B, T), 0, V)
    h0 = jax.random.normal(keys[19], (2, B, H), jnp.float32)
    c0 = jax.random.normal(keys[20], (2, B, H), jnp.float32)

    # embedding lookup; embedding_dropout treated as eval-mode identity
    # TODO(synk): training-mode Dropout(p=0.3) is stochastic and omitted.
    embeddings = jnp.take(emb_table, x, axis=0)                        # (B, T, 300)
    outputs = lstm_bidirectional(
        embeddings, h0, c0, (Wih_f, Whh_f, b_f, Wih_b, Whh_b, b_b))    # (B, T, 2H)

    pred = attention_pallas(outputs, label_embed,
                            W1, b1, W2, b2, Wg1, bg1, Wg2, bg2, Wo, bo)
    pred = jax.block_until_ready(pred)

    ref = forward_reference(outputs, label_embed,
                            W1, b1, W2, b2, Wg1, bg1, Wg2, bg2, Wo, bo, C, H)

    assert pred.shape == (B, C)
    assert bool(jnp.all(jnp.isfinite(pred)))
    # tolerance 2e-2: kernel uses bf16 MXU inputs (f32 accumulation) vs f32 reference
    assert bool(jnp.allclose(pred, ref, atol=2e-2, rtol=2e-2))
    print("KERNEL_OK")
</pallas_src>

<mosaic_0001>
module attributes {stable_mosaic.version = 11 : i64} {
  func.func @_attention_kernel(%arg0: i32, %arg1: memref<2x8x32xbf16, #tpu.memory_space<vmem>>, %arg2: memref<2x8x32xbf16, #tpu.memory_space<vmem>>, %arg3: memref<4x32xbf16, #tpu.memory_space<vmem>>, %arg4: memref<32x16xbf16, #tpu.memory_space<vmem>>, %arg5: memref<32x16xbf16, #tpu.memory_space<vmem>>, %arg6: memref<1x16xf32, #tpu.memory_space<vmem>>, %arg7: memref<16x4xbf16, #tpu.memory_space<vmem>>, %arg8: memref<1x4xf32, #tpu.memory_space<vmem>>, %arg9: memref<32x2xbf16, #tpu.memory_space<vmem>>, %arg10: memref<32x2xbf16, #tpu.memory_space<vmem>>, %arg11: memref<2xf32, #tpu.memory_space<smem>>, %arg12: memref<32x128xbf16, #tpu.memory_space<vmem>>, %arg13: memref<32x128xbf16, #tpu.memory_space<vmem>>, %arg14: memref<1x128xf32, #tpu.memory_space<vmem>>, %arg15: memref<2x128xf32, #tpu.memory_space<vmem>>) attributes {dimension_semantics = [#tpu.dimension_semantics<parallel>], iteration_bounds = array<i64: 1>, scalar_prefetch = 0 : i64, scratch_operands = 0 : i64, tpu.core_type = #tpu.core_type<tc>, window_params = [{transform_indices = @transform_0, window_bounds = array<i64: 2, 8, 32>}, {transform_indices = @transform_1, window_bounds = array<i64: 2, 8, 32>}, {pipeline_mode = #tpu.pipeline_mode<synchronous>, transform_indices = @transform_2, window_bounds = array<i64: 4, 32>}, {pipeline_mode = #tpu.pipeline_mode<synchronous>, transform_indices = @transform_3, window_bounds = array<i64: 32, 16>}, {pipeline_mode = #tpu.pipeline_mode<synchronous>, transform_indices = @transform_4, window_bounds = array<i64: 32, 16>}, {pipeline_mode = #tpu.pipeline_mode<synchronous>, transform_indices = @transform_5, window_bounds = array<i64: 1, 16>}, {pipeline_mode = #tpu.pipeline_mode<synchronous>, transform_indices = @transform_6, window_bounds = array<i64: 16, 4>}, {pipeline_mode = #tpu.pipeline_mode<synchronous>, transform_indices = @transform_7, window_bounds = array<i64: 1, 4>}, {pipeline_mode = #tpu.pipeline_mode<synchronous>, transform_indices = @transform_8, window_bounds = array<i64: 32, 2>}, {pipeline_mode = #tpu.pipeline_mode<synchronous>, transform_indices = @transform_9, window_bounds = array<i64: 32, 2>}, {transform_indices = @transform_10, window_bounds = array<i64: 2>}, {pipeline_mode = #tpu.pipeline_mode<synchronous>, transform_indices = @transform_11, window_bounds = array<i64: 32, 128>}, {pipeline_mode = #tpu.pipeline_mode<synchronous>, transform_indices = @transform_12, window_bounds = array<i64: 32, 128>}, {pipeline_mode = #tpu.pipeline_mode<synchronous>, transform_indices = @transform_13, window_bounds = array<i64: 1, 128>}, {transform_indices = @transform_14, window_bounds = array<i64: 2, 128>}]} {
    %c0 = arith.constant 0 : index
    %c0_0 = arith.constant 0 : index
    %c0_1 = arith.constant 0 : index
    %0 = vector.load %arg1[%c0, %c0_0, %c0_1] : memref<2x8x32xbf16, #tpu.memory_space<vmem>>, vector<2x8x32xbf16>
    %c0_2 = arith.constant 0 : index
    %c0_3 = arith.constant 0 : index
    %c0_4 = arith.constant 0 : index
    %1 = vector.load %arg2[%c0_2, %c0_3, %c0_4] : memref<2x8x32xbf16, #tpu.memory_space<vmem>>, vector<2x8x32xbf16>
    %c0_5 = arith.constant 0 : index
    %c0_6 = arith.constant 0 : index
    %2 = vector.load %arg3[%c0_5, %c0_6] : memref<4x32xbf16, #tpu.memory_space<vmem>>, vector<4x32xbf16>
    %3 = vector.shape_cast %0 : vector<2x8x32xbf16> to vector<16x32xbf16>
    %4 = vector.shape_cast %1 : vector<2x8x32xbf16> to vector<16x32xbf16>
    %c0_7 = arith.constant 0 : index
    %c0_8 = arith.constant 0 : index
    %5 = vector.load %arg4[%c0_7, %c0_8] : memref<32x16xbf16, #tpu.memory_space<vmem>>, vector<32x16xbf16>
    %cst = arith.constant dense<0.000000e+00> : vector<16x16xf32>
    %6 = tpu.matmul %3, %5, %cst {dimension_numbers = #tpu.dot_dimension_numbers<[1], [0], [0], [1], [0, 0, 1, 1], [], []>} : vector<16x32xbf16>, vector<32x16xbf16>, vector<16x16xf32> -> vector<16x16xf32>
    %c0_9 = arith.constant 0 : index
    %c0_10 = arith.constant 0 : index
    %7 = vector.load %arg5[%c0_9, %c0_10] : memref<32x16xbf16, #tpu.memory_space<vmem>>, vector<32x16xbf16>
    %cst_11 = arith.constant dense<0.000000e+00> : vector<16x16xf32>
    %8 = tpu.matmul %4, %7, %cst_11 {dimension_numbers = #tpu.dot_dimension_numbers<[1], [0], [0], [1], [0, 0, 1, 1], [], []>} : vector<16x32xbf16>, vector<32x16xbf16>, vector<16x16xf32> -> vector<16x16xf32>
    %9 = arith.addf %6, %8 : vector<16x16xf32>
    %c0_12 = arith.constant 0 : index
    %c0_13 = arith.constant 0 : index
    %10 = vector.load %arg6[%c0_12, %c0_13] : memref<1x16xf32, #tpu.memory_space<vmem>>, vector<1x16xf32>
    %11 = vector.broadcast %10 : vector<1x16xf32> to vector<16x16xf32>
    %12 = arith.addf %9, %11 : vector<16x16xf32>
    %13 = math.tanh %12 : vector<16x16xf32>
    %14 = arith.truncf %13 : vector<16x16xf32> to vector<16x16xbf16>
    %c0_14 = arith.constant 0 : index
    %c0_15 = arith.constant 0 : index
    %15 = vector.load %arg7[%c0_14, %c0_15] : memref<16x4xbf16, #tpu.memory_space<vmem>>, vector<16x4xbf16>
    %cst_16 = arith.constant dense<0.000000e+00> : vector<16x4xf32>
    %16 = tpu.matmul %14, %15, %cst_16 {dimension_numbers = #tpu.dot_dimension_numbers<[1], [0], [0], [1], [0, 0, 1, 1], [], []>} : vector<16x16xbf16>, vector<16x4xbf16>, vector<16x4xf32> -> vector<16x4xf32>
    %c0_17 = arith.constant 0 : index
    %c0_18 = arith.constant 0 : index
    %17 = vector.load %arg8[%c0_17, %c0_18] : memref<1x4xf32, #tpu.memory_space<vmem>>, vector<1x4xf32>
    %18 = vector.broadcast %17 : vector<1x4xf32> to vector<16x4xf32>
    %19 = arith.addf %16, %18 : vector<16x4xf32>
    %20 = vector.shape_cast %19 : vector<16x4xf32> to vector<2x8x4xf32>
    %cst_19 = arith.constant dense<0xFF800000> : vector<2x4xf32>
    %21 = vector.multi_reduction <maximumf>, %20, %cst_19 [1] : vector<2x8x4xf32> to vector<2x4xf32>
    %22 = vector.shape_cast %21 : vector<2x4xf32> to vector<2x1x4xf32>
    %23 = vector.broadcast %22 : vector<2x1x4xf32> to vector<2x8x4xf32>
    %24 = arith.subf %20, %23 : vector<2x8x4xf32>
    %25 = math.exp %24 : vector<2x8x4xf32>
    %cst_20 = arith.constant dense<0.000000e+00> : vector<2x4xf32>
    %26 = vector.multi_reduction <add>, %25, %cst_20 [1] : vector<2x8x4xf32> to vector<2x4xf32>
    %27 = vector.shape_cast %26 : vector<2x4xf32> to vector<2x1x4xf32>
    %28 = tpu.reciprocal %27 {approx = true} : vector<2x1x4xf32> -> vector<2x1x4xf32>
    %29 = vector.broadcast %28 : vector<2x1x4xf32> to vector<2x8x4xf32>
    %30 = arith.mulf %25, %29 : vector<2x8x4xf32>
    %31 = tpu.transpose %30, [0, 2, 1] : vector<2x8x4xf32> -> vector<2x4x8xf32>
    %32 = arith.truncf %31 : vector<2x4x8xf32> to vector<2x4x8xbf16>
    %cst_21 = arith.constant dense<0.000000e+00> : vector<16x4xf32>
    %33 = tpu.matmul %3, %2, %cst_21 {dimension_numbers = #tpu.dot_dimension_numbers<[1], [1], [0], [0], [0, 0, 1, 0], [], []>} : vector<16x32xbf16>, vector<4x32xbf16>, vector<16x4xf32> -> vector<16x4xf32>
    %cst_22 = arith.constant dense<0.000000e+00> : vector<16x4xf32>
    %34 = tpu.matmul %4, %2, %cst_22 {dimension_numbers = #tpu.dot_dimension_numbers<[1], [1], [0], [0], [0, 0, 1, 0], [], []>} : vector<16x32xbf16>, vector<4x32xbf16>, vector<16x4xf32> -> vector<16x4xf32>
    %35 = vector.shape_cast %33 : vector<16x4xf32> to vector<2x8x4xf32>
    %36 = tpu.transpose %35, [0, 2, 1] : vector<2x8x4xf32> -> vector<2x4x8xf32>
    %37 = arith.truncf %36 : vector<2x4x8xf32> to vector<2x4x8xbf16>
    %38 = vector.shape_cast %34 : vector<16x4xf32> to vector<2x8x4xf32>
    %39 = tpu.transpose %38, [0, 2, 1] : vector<2x8x4xf32> -> vector<2x4x8xf32>
    %40 = arith.truncf %39 : vector<2x4x8xf32> to vector<2x4x8xbf16>
    %41 = tpu.concatenate %37, %32 in 1 : vector<2x4x8xbf16>, vector<2x4x8xbf16> -> vector<2x8x8xbf16>
    %42 = tpu.concatenate %40, %32 in 1 : vector<2x4x8xbf16>, vector<2x4x8xbf16> -> vector<2x8x8xbf16>
    "tpu.trace_start"() <{level = 10 : i32, message = "bct,bth->bch"}> : () -> ()
    %cst_23 = arith.constant dense<0.000000e+00> : vector<2x8x32xf32>
    %43 = tpu.matmul %41, %0, %cst_23 {dimension_numbers = #tpu.dot_dimension_numbers<[2], [1], [1], [2], [0, 0, 0, 1, 1, 2], [0], [0]>} : vector<2x8x8xbf16>, vector<2x8x32xbf16>, vector<2x8x32xf32> -> vector<2x8x32xf32>
    %cst_24 = arith.constant dense<0.000000e+00> : vector<2x8x32xf32>
    %44 = tpu.matmul %42, %1, %cst_24 {dimension_numbers = #tpu.dot_dimension_numbers<[2], [1], [1], [2], [0, 0, 0, 1, 1, 2], [0], [0]>} : vector<2x8x8xbf16>, vector<2x8x32xbf16>, vector<2x8x32xf32> -> vector<2x8x32xf32>
    "tpu.trace_stop"() : () -> ()
    %45 = vector.extract_strided_slice %43 {offsets = [0, 0, 0], sizes = [2, 4, 32], strides = [1, 1, 1]} : vector<2x8x32xf32> to vector<2x4x32xf32>
    %46 = vector.extract_strided_slice %43 {offsets = [0, 4, 0], sizes = [2, 4, 32], strides = [1, 1, 1]} : vector<2x8x32xf32> to vector<2x4x32xf32>
    %47 = vector.extract_strided_slice %44 {offsets = [0, 0, 0], sizes = [2, 4, 32], strides = [1, 1, 1]} : vector<2x8x32xf32> to vector<2x4x32xf32>
    %48 = vector.extract_strided_slice %44 {offsets = [0, 4, 0], sizes = [2, 4, 32], strides = [1, 1, 1]} : vector<2x8x32xf32> to vector<2x4x32xf32>
    %49 = vector.shape_cast %43 : vector<2x8x32xf32> to vector<16x32xf32>
    %50 = arith.truncf %49 : vector<16x32xf32> to vector<16x32xbf16>
    %c0_25 = arith.constant 0 : index
    %c0_26 = arith.constant 0 : index
    %51 = vector.load %arg9[%c0_25, %c0_26] : memref<32x2xbf16, #tpu.memory_space<vmem>>, vector<32x2xbf16>
    %cst_27 = arith.constant dense<0.000000e+00> : vector<16x2xf32>
    %52 = tpu.matmul %50, %51, %cst_27 {dimension_numbers = #tpu.dot_dimension_numbers<[1], [0], [0], [1], [0, 0, 1, 1], [], []>} : vector<16x32xbf16>, vector<32x2xbf16>, vector<16x2xf32> -> vector<16x2xf32>
    %53 = vector.shape_cast %44 : vector<2x8x32xf32> to vector<16x32xf32>
    %54 = arith.truncf %53 : vector<16x32xf32> to vector<16x32xbf16>
    %c0_28 = arith.constant 0 : index
    %c0_29 = arith.constant 0 : index
    %55 = vector.load %arg10[%c0_28, %c0_29] : memref<32x2xbf16, #tpu.memory_space<vmem>>, vector<32x2xbf16>
    %cst_30 = arith.constant dense<0.000000e+00> : vector<16x2xf32>
    %56 = tpu.matmul %54, %55, %cst_30 {dimension_numbers = #tpu.dot_dimension_numbers<[1], [0], [0], [1], [0, 0, 1, 1], [], []>} : vector<16x32xbf16>, vector<32x2xbf16>, vector<16x2xf32> -> vector<16x2xf32>
    %57 = arith.addf %52, %56 : vector<16x2xf32>
    %58 = vector.shape_cast %57 : vector<16x2xf32> to vector<2x8x2xf32>
    %59 = vector.extract_strided_slice %58 {offsets = [0, 0, 0], sizes = [2, 4, 1], strides = [1, 1, 1]} : vector<2x8x2xf32> to vector<2x4x1xf32>
    %c0_31 = arith.constant 0 : index
    %60 = memref.load %arg11[%c0_31] : memref<2xf32, #tpu.memory_space<smem>>
    %61 = vector.broadcast %60 : f32 to vector<2x4x1xf32>
    %62 = arith.addf %59, %61 : vector<2x4x1xf32>
    %63 = arith.negf %62 : vector<2x4x1xf32>
    %64 = math.exp %63 : vector<2x4x1xf32>
    %cst_32 = arith.constant 1.000000e+00 : f32
    %65 = vector.broadcast %cst_32 : f32 to vector<2x4x1xf32>
    %66 = arith.addf %65, %64 : vector<2x4x1xf32>
    %67 = arith.divf %65, %66 : vector<2x4x1xf32>
    %68 = vector.extract_strided_slice %58 {offsets = [0, 4, 1], sizes = [2, 4, 1], strides = [1, 1, 1]} : vector<2x8x2xf32> to vector<2x4x1xf32>
    %c1 = arith.constant 1 : index
    %69 = memref.load %arg11[%c1] : memref<2xf32, #tpu.memory_space<smem>>
    %70 = vector.broadcast %69 : f32 to vector<2x4x1xf32>
    %71 = arith.addf %68, %70 : vector<2x4x1xf32>
    %72 = arith.negf %71 : vector<2x4x1xf32>
    %73 = math.exp %72 : vector<2x4x1xf32>
    %cst_33 = arith.constant 1.000000e+00 : f32
    %74 = vector.broadcast %cst_33 : f32 to vector<2x4x1xf32>
    %75 = arith.addf %74, %73 : vector<2x4x1xf32>
    %76 = arith.divf %74, %75 : vector<2x4x1xf32>
    %77 = arith.addf %67, %76 : vector<2x4x1xf32>
    %78 = tpu.reciprocal %77 {approx = true} : vector<2x4x1xf32> -> vector<2x4x1xf32>
    %79 = arith.mulf %67, %78 : vector<2x4x1xf32>
    %cst_34 = arith.constant 1.000000e+00 : f32
    %80 = vector.broadcast %cst_34 : f32 to vector<2x4x1xf32>
    %81 = arith.subf %80, %79 : vector<2x4x1xf32>
    %82 = vector.broadcast %79 : vector<2x4x1xf32> to vector<2x4x32xf32>
    %83 = arith.mulf %82, %45 : vector<2x4x32xf32>
    %84 = vector.broadcast %81 : vector<2x4x1xf32> to vector<2x4x32xf32>
    %85 = arith.mulf %84, %46 : vector<2x4x32xf32>
    %86 = arith.addf %83, %85 : vector<2x4x32xf32>
    %cst_35 = arith.constant dense<0.000000e+00> : vector<2x32xf32>
    %87 = vector.multi_reduction <add>, %86, %cst_35 [1] : vector<2x4x32xf32> to vector<2x32xf32>
    %cst_36 = arith.constant 2.500000e-01 : f32
    %88 = vector.broadcast %cst_36 : f32 to vector<2x32xf32>
    %89 = arith.mulf %87, %88 : vector<2x32xf32>
    %90 = vector.broadcast %79 : vector<2x4x1xf32> to vector<2x4x32xf32>
    %91 = arith.mulf %90, %47 : vector<2x4x32xf32>
    %92 = vector.broadcast %81 : vector<2x4x1xf32> to vector<2x4x32xf32>
    %93 = arith.mulf %92, %48 : vector<2x4x32xf32>
    %94 = arith.addf %91, %93 : vector<2x4x32xf32>
    %cst_37 = arith.constant dense<0.000000e+00> : vector<2x32xf32>
    %95 = vector.multi_reduction <add>, %94, %cst_37 [1] : vector<2x4x32xf32> to vector<2x32xf32>
    %cst_38 = arith.constant 2.500000e-01 : f32
    %96 = vector.broadcast %cst_38 : f32 to vector<2x32xf32>
    %97 = arith.mulf %95, %96 : vector<2x32xf32>
    %98 = arith.truncf %89 : vector<2x32xf32> to vector<2x32xbf16>
    %c0_39 = arith.constant 0 : index
    %c0_40 = arith.constant 0 : index
    %99 = vector.load %arg12[%c0_39, %c0_40] : memref<32x128xbf16, #tpu.memory_space<vmem>>, vector<32x128xbf16>
    %cst_41 = arith.constant dense<0.000000e+00> : vector<2x128xf32>
    %100 = tpu.matmul %98, %99, %cst_41 {dimension_numbers = #tpu.dot_dimension_numbers<[1], [0], [0], [1], [0, 0, 1, 1], [], []>} : vector<2x32xbf16>, vector<32x128xbf16>, vector<2x128xf32> -> vector<2x128xf32>
    %101 = arith.truncf %97 : vector<2x32xf32> to vector<2x32xbf16>
    %c0_42 = arith.constant 0 : index
    %c0_43 = arith.constant 0 : index
    %102 = vector.load %arg13[%c0_42, %c0_43] : memref<32x128xbf16, #tpu.memory_space<vmem>>, vector<32x128xbf16>
    %cst_44 = arith.constant dense<0.000000e+00> : vector<2x128xf32>
    %103 = tpu.matmul %101, %102, %cst_44 {dimension_numbers = #tpu.dot_dimension_numbers<[1], [0], [0], [1], [0, 0, 1, 1], [], []>} : vector<2x32xbf16>, vector<32x128xbf16>, vector<2x128xf32> -> vector<2x128xf32>
    %104 = arith.addf %100, %103 : vector<2x128xf32>
    %c0_45 = arith.constant 0 : index
    %c0_46 = arith.constant 0 : index
    %105 = vector.load %arg14[%c0_45, %c0_46] : memref<1x128xf32, #tpu.memory_space<vmem>>, vector<1x128xf32>
    %106 = vector.broadcast %105 : vector<1x128xf32> to vector<2x128xf32>
    %107 = arith.addf %104, %106 : vector<2x128xf32>
    %108 = arith.negf %107 : vector<2x128xf32>
    %109 = math.exp %108 : vector<2x128xf32>
    %cst_47 = arith.constant 1.000000e+00 : f32
    %110 = vector.broadcast %cst_47 : f32 to vector<2x128xf32>
    %111 = arith.addf %110, %109 : vector<2x128xf32>
    %112 = arith.divf %110, %111 : vector<2x128xf32>
    %c0_48 = arith.constant 0 : index
    %c0_49 = arith.constant 0 : index
    %113 = vector.load %arg15[%c0_48, %c0_49] : memref<2x128xf32, #tpu.memory_space<vmem>>, vector<2x128xf32>
    tpu.vector_store %arg15[%c0_48, %c0_49], %112 {strides = array<i32>} : memref<2x128xf32, #tpu.memory_space<vmem>>, vector<2x128xf32>,
    return
  }
  func.func @transform_0(%arg0: i32) -> (i32, i32, i32) {
    %c0_i32 = arith.constant 0 : i32
    %c0_i32_0 = arith.constant 0 : i32
    %c0_i32_1 = arith.constant 0 : i32
    return %arg0, %c0_i32, %c0_i32_0 : i32, i32, i32
  }
  func.func @transform_1(%arg0: i32) -> (i32, i32, i32) {
    %c0_i32 = arith.constant 0 : i32
    %c0_i32_0 = arith.constant 0 : i32
    %c0_i32_1 = arith.constant 0 : i32
    return %arg0, %c0_i32, %c0_i32_0 : i32, i32, i32
  }
  func.func @transform_2(%arg0: i32) -> (i32, i32) {
    %c0_i32 = arith.constant 0 : i32
    %c0_i32_0 = arith.constant 0 : i32
    %c0_i32_1 = arith.constant 0 : i32
    return %c0_i32, %c0_i32_0 : i32, i32
  }
  func.func @transform_3(%arg0: i32) -> (i32, i32) {
    %c0_i32 = arith.constant 0 : i32
    %c0_i32_0 = arith.constant 0 : i32
    %c0_i32_1 = arith.constant 0 : i32
    return %c0_i32, %c0_i32_0 : i32, i32
  }
  func.func @transform_4(%arg0: i32) -> (i32, i32) {
    %c0_i32 = arith.constant 0 : i32
    %c0_i32_0 = arith.constant 0 : i32
    %c0_i32_1 = arith.constant 0 : i32
    return %c0_i32, %c0_i32_0 : i32, i32
  }
  func.func @transform_5(%arg0: i32) -> (i32, i32) {
    %c0_i32 = arith.constant 0 : i32
    %c0_i32_0 = arith.constant 0 : i32
    %c0_i32_1 = arith.constant 0 : i32
    return %c0_i32, %c0_i32_0 : i32, i32
  }
  func.func @transform_6(%arg0: i32) -> (i32, i32) {
    %c0_i32 = arith.constant 0 : i32
    %c0_i32_0 = arith.constant 0 : i32
    %c0_i32_1 = arith.constant 0 : i32
    return %c0_i32, %c0_i32_0 : i32, i32
  }
  func.func @transform_7(%arg0: i32) -> (i32, i32) {
    %c0_i32 = arith.constant 0 : i32
    %c0_i32_0 = arith.constant 0 : i32
    %c0_i32_1 = arith.constant 0 : i32
    return %c0_i32, %c0_i32_0 : i32, i32
  }
  func.func @transform_8(%arg0: i32) -> (i32, i32) {
    %c0_i32 = arith.constant 0 : i32
    %c0_i32_0 = arith.constant 0 : i32
    %c0_i32_1 = arith.constant 0 : i32
    return %c0_i32, %c0_i32_0 : i32, i32
  }
  func.func @transform_9(%arg0: i32) -> (i32, i32) {
    %c0_i32 = arith.constant 0 : i32
    %c0_i32_0 = arith.constant 0 : i32
    %c0_i32_1 = arith.constant 0 : i32
    return %c0_i32, %c0_i32_0 : i32, i32
  }
  func.func @transform_10(%arg0: i32) -> i32 {
    %c0_i32 = arith.constant 0 : i32
    %c0_i32_0 = arith.constant 0 : i32
    return %c0_i32 : i32
  }
  func.func @transform_11(%arg0: i32) -> (i32, i32) {
    %c0_i32 = arith.constant 0 : i32
    %c0_i32_0 = arith.constant 0 : i32
    %c0_i32_1 = arith.constant 0 : i32
    return %c0_i32, %c0_i32_0 : i32, i32
  }
  func.func @transform_12(%arg0: i32) -> (i32, i32) {
    %c0_i32 = arith.constant 0 : i32
    %c0_i32_0 = arith.constant 0 : i32
    %c0_i32_1 = arith.constant 0 : i32
    return %c0_i32, %c0_i32_0 : i32, i32
  }
  func.func @transform_13(%arg0: i32) -> (i32, i32) {
    %c0_i32 = arith.constant 0 : i32
    %c0_i32_0 = arith.constant 0 : i32
    %c0_i32_1 = arith.constant 0 : i32
    return %c0_i32, %c0_i32_0 : i32, i32
  }
  func.func @transform_14(%arg0: i32) -> (i32, i32) {
    %c0_i32 = arith.constant 0 : i32
    %c0_i32_0 = arith.constant 0 : i32
    return %arg0, %c0_i32 : i32, i32
  }
}

</mosaic_0001>

<bundles_post_ra>
// kernel: tpu_custom_call.1
= control target key start
LH: loop header
LB: loop body
LE: loop exit
PB: predicated region body
PF: predicated region fallthrough
CT: control target
= control target key end

     0   :  { %19 = vsyncpa [#allocation4], 0  ;;  %s1310_s0 = inlined_call_operand.vmem [shape: bf16[2,8,32], index: 0, kind: input, shape index: {}]   ;;  %s1311_s1 = inlined_call_operand.vmem [shape: bf16[2,8,32], index: 1, kind: input, shape index: {}]   ;;  %s1312_s2 = inlined_call_operand.vmem [shape: bf16[4,32], index: 2, kind: input, shape index: {}]   ;;  %s1313_s3 = inlined_call_operand.vmem [shape: bf16[32,16], index: 3, kind: input, shape index: {}]   ;;  %s1314_s4 = inlined_call_operand.vmem [shape: bf16[32,16], index: 4, kind: input, shape index: {}]   ;;  %s1315_s5 = inlined_call_operand.vmem [shape: f32[1,16], index: 5, kind: input, shape index: {}]   ;;  %s1316_s6 = inlined_call_operand.vmem [shape: bf16[16,4], index: 6, kind: input, shape index: {}]   ;;  %s1317_s7 = inlined_call_operand.vmem [shape: f32[1,4], index: 7, kind: input, shape index: {}]   ;;  %s1318_s8 = inlined_call_operand.vmem [shape: bf16[32,2], index: 8, kind: input, shape index: {}]   ;;  %s1319_s9 = inlined_call_operand.vmem [shape: bf16[32,2], index: 9, kind: input, shape index: {}]   ;;  %s1320_s10 = inlined_call_operand.vmem [shape: f32[2], index: 10, kind: input, shape index: {}]   ;;  %s1321_s11 = inlined_call_operand.vmem [shape: bf16[32,128], index: 11, kind: input, shape index: {}]   ;;  %s1322_s12 = inlined_call_operand.vmem [shape: bf16[32,128], index: 12, kind: input, shape index: {}]   ;;  %s1323_s13 = inlined_call_operand.vmem [shape: f32[1,128], index: 13, kind: input, shape index: {}]   ;;  %s1324_s14 = inlined_call_operand.hbm [shape: f32[2,128], index: 14, kind: output, shape index: {}]  }
   0x1   :  { %20 = vsyncpa [#allocation3], 0  ;;  %s46_s15 = sshll.u32 %s1320_s10, 4  ;;  %s1115_s16 = smov [#allocation2]   ;;  %s47_s15 = int_to_ptr.vmem [resolvable:$true] %s46_s15 }
   0x2   :  { %49 = dma.vmem_to_smem %s47_s15, 16, %s1115_s16, [#allocation4]  }
   0x3   :  { %1111 = dma.done.wait [#allocation4], 16  }
   0x4   :  { %1112 = vsyncadd [#allocation4], 4294967280 }
   0x5   :  { %60 = sfence }
   0x6   :  { %v998_v0 = vld [vmem:[%s1314_s4 + $0x8] sm:$0xff]  ;;  %v997_v2 = vld [vmem:[%s1314_s4] sm:$0xff]  ;;  %vm92_vm0 = vcmask 261120   ;;  %vm165_vm1 = vcmask 130048   ;;  %vm183_vm2 = vcmask 31744   ;;  %vm473_vm3 = vcmask 1043456  }
   0x7   :  { %v996_v1 = vld [vmem:[%s1313_s3 + $0x8] sm:$0xff]  ;;  %v995_v3 = vld [vmem:[%s1313_s3] sm:$0xff]  ;;  %102 = vmatpush.bf16.msra.mxu0 %v998_v0  ;;  %vm459_vm4 = vcmask 1041408   ;;  %vm470_vm5 = vcmask 64512   ;;  %s612_s27 = sld [smem:[#allocation2]]  ;;  %s904_s17 = sshll.u32 %s1324_s14, 4  ;;  %s905_s17 = int_to_ptr.hbm [resolvable:$true] %s904_s17 }
   0x8   :  { %136 = vmatpush.bf16.msra.mxu1 %v996_v1  ;;  %v994_v4 = vld [vmem:[%s1311_s1] sm:$0xff] }
   0x9   :  { %v993_v5 = vld [vmem:[%s1310_s0] sm:$0xff] }
   0xa   :  { %v999_v6 = vld [vmem:[%s1316_s6] sm:$0xff] }
   0xb   :  { %103 = vmatpush.bf16.msra.mxu0 %v997_v2  ;;  %176 = vmatpush.bf16.msra.mxu2 %v999_v6  ;;  %v66_v7 = vld [vmem:[%s1312_s2] sm:$0x3]  ;;  %v65_v56 = vld [vmem:[%s1311_s1 + $0x4] sm:$0xf] }
   0xc   :  { %137 = vmatpush.bf16.msra.mxu1 %v995_v3  ;;  %v289_v8 = vsel %vm92_vm0, %v66_v7, 0  ;;  %v1036_v12 = vld [vmem:[%s1315_s5] ss:$0 sm:$0xff]  ;;  %v529_v59 = vsel %vm473_vm3, %v65_v56, 0  ;;  %s1118_s5 = smov [#allocation5]  }
   0xd   :  { %298 = vmatpush.bf16.xpose.msra.mxu3 %v289_v8  ;;  %v1037_v21 = vld [vmem:[%s1317_s7] ss:$0 sm:$0xff] }
   0xe   :  { %926 = vmatmul.msk.bf16.vlgmr.msra.gmra.mxu0 %vm92_vm0, %v994_v4  ;;  %v64_v55 = vld [vmem:[%s1311_s1] sm:$0xf] }
   0xf   :  { %939 = vmatmul.msk.bf16.vlgmr.msra.gmra.mxu1 %vm92_vm0, %v993_v5  ;;  %312 = vmatpush.bf16.xpose.msrb.mxu2 %v289_v8  ;;  %v511_v58 = vsel %vm473_vm3, %v64_v55, 0 }
  0x14   :  { %945 = vmatmul.msk.bf16.vlgmr.msra.gmra.mxu3 %vm92_vm0, %v993_v5 }
  0x15   :  { %520 = vmatpush.bf16.msrb.mxu3 %v511_v58 }
  0x8b   :  { %v105_v9 = vpop.f32.mrf.mxu0 }
  0x8c   :  { %v139_v10 = vpop.f32.mrf.mxu1 }
  0x8d   :  { %v140_v11 = vadd.f32 %v139_v10, %v105_v9 }
  0x8f   :  { %v148_v13 = vadd.f32 %v1036_v12, %v140_v11 }
  0x91   :  { %1039 = vtanh.f32 %v148_v13  ;;  %v63_v13 = vld [vmem:[%s1310_s0 + $0x4] sm:$0xf] }
  0x93   :  { %v107_v14 = vpop.f32.mrf.mxu0 }
  0x94   :  { %v141_v15 = vpop.f32.mrf.mxu1 }
  0x95   :  { %v142_v16 = vadd.f32 %v141_v15, %v107_v14  ;;  %v493_v15 = vsel %vm473_vm3, %v63_v13, 0 }
  0x96   :  { %502 = vmatpush.bf16.msrb.mxu1 %v493_v15 }
  0x97   :  { %v149_v17 = vadd.f32 %v1036_v12, %v142_v16  ;;  %v1040_v18 = vpop.eup %1039  ;;  %v300_v38 = vpop.f32.mrf.mxu3  ;;  %v62_v12 = vld [vmem:[%s1310_s0] sm:$0xf]  ;;  %v1003_v16 = vld [vmem:[%s1319_s9 + $0x8] sm:$0xff] }
  0x98   :  { %v475_v14 = vsel %vm473_vm3, %v62_v12, 0 }
  0x99   :  { %1041 = vtanh.f32 %v149_v17  ;;  %484 = vmatpush.bf16.msrb.mxu0 %v475_v14  ;;  %v1001_v17 = vld [vmem:[%s1318_s8 + $0x8] sm:$0xff] }
  0x9a   :  { %604 = vmatpush.bf16.msra.mxu1 %v1001_v17 }
  0x9d   :  { %575 = vmatpush.bf16.msra.mxu0 %v1003_v16 }
  0x9f   :  { %v1042_v19 = vpop.eup %1041  ;;  %v302_v47 = vpop.f32.mrf.mxu3 }
  0xa0   :  { %v152_v20 = vpack.c.bf16 %v1042_v19, %v1040_v18  ;;  %v1027_v49 = vpack.i.bf16 %v302_v47, %v300_v38 }
  0xa2   :  { %944 = vmatmul.msk.bf16.vlgmr.msra.gmra.mxu2 %vm165_vm1, %v152_v20  ;;  %1028 = vxpose.xlu1.b32.start.end [1/1] (short) (narrow) %v1027_v49, 8 }
  0xa3   :  { %538 = vmatpush.bf16.msra.mxu2 %v529_v59 }
  0xb2   :  { %946 = vmatmul.msk.bf16.vlgmr.msrb.gmra.mxu2 %vm92_vm0, %v994_v4 }
 0x125   :  { %v178_v22 = vpop.f32.mrf.mxu2 }
 0x126   :  { %v179_v23 = vadd.f32 %v1037_v21, %v178_v22 }
 0x128   :  { %v184_v24 = vsel %vm183_vm2, %v179_v23, -inf }
 0x129   :  { %v185_v25 = vrot.slane %v184_v24, 4 }
 0x12b   :  { %v186_v26 = vmax.f32 %v184_v24, %v185_v25 }
 0x12d   :  { %v187_v27 = vrot.slane %v186_v26, 2  ;;  %v180_v28 = vpop.f32.mrf.mxu2 }
 0x12e   :  { %v181_v29 = vadd.f32 %v1037_v21, %v180_v28 }
 0x12f   :  { %v188_v30 = vmax.f32 %v186_v26, %v187_v27 }
 0x130   :  { %v191_v31 = vsel %vm183_vm2, %v181_v29, -inf }
 0x131   :  { %v189_v32 = vrot.slane %v188_v30, 1  ;;  %v192_v33 = vrot.slane %v191_v31, 4 }
 0x133   :  { %v190_v34 = vmax.f32 %v188_v30, %v189_v32  ;;  %v193_v35 = vmax.f32 %v191_v31, %v192_v33 }
 0x135   :  { %v198_v36 = vsub.f32 %v179_v23, %v190_v34  ;;  %v194_v37 = vrot.slane %v193_v35, 2  ;;  %v314_v4 = vpop.f32.mrf.mxu2 }
 0x137   :  { %v200_v39 = vmul.f32 1.442695, %v198_v36  ;;  %v195_v40 = vmax.f32 %v193_v35, %v194_v37 }
 0x139   :  { %1043 = vpow2.f32 %v200_v39  ;;  %v196_v41 = vrot.slane %v195_v40, 1 }
 0x13b   :  { %v197_v42 = vmax.f32 %v195_v40, %v196_v41 }
 0x13d   :  { %v199_v43 = vsub.f32 %v181_v29, %v197_v42  ;;  %v316_v9 = vpop.f32.mrf.mxu2  ;;  %v1000_v42 = vld [vmem:[%s1318_s8] sm:$0xff]  ;;  %s971_s8 = sld [smem:[#allocation2 + $0x1]] }
 0x13e   :  { %v1020_v10 = vpack.i.bf16 %v316_v9, %v314_v4  ;;  %605 = vmatpush.bf16.msra.mxu1 %v1000_v42 }
 0x13f   :  { %v1044_v44 = vpop.eup %1043  ;;  %v202_v45 = vmul.f32 1.442695, %v199_v43  ;;  %v1002_v43 = vld [vmem:[%s1319_s9] sm:$0xff]  ;;  %s1116_s9 = smov 127  }
 0x140   :  { %v204_v46 = vsel %vm183_vm2, %v1044_v44, 0.0  ;;  %576 = vmatpush.bf16.msra.mxu0 %v1002_v43 }
 0x141   :  { %v205_v48 = vrot.slane %v204_v46, 4  ;;  %1045 = vpow2.f32 %v202_v45 }
 0x143   :  { %v206_v50 = vadd.f32 %v205_v48, %v204_v46  ;;  %v655_v56 = vstv %s971_s8 }
 0x145   :  { %v207_v51 = vrot.slane %v206_v50, 2 }
 0x146   :  { %v1029_v11 = vpop.trf.xlu1 }
 0x147   :  { %v1046_v52 = vpop.eup %1045  ;;  %v208_v53 = vadd.f32 %v207_v51, %v206_v50  ;;  %v1033_v23 = vunpack.i.h.bf16 %v1029_v11  ;;  %v1030_v24 = vunpack.i.l.bf16 %v1029_v11 }
 0x148   :  { %v211_v54 = vsel %vm183_vm2, %v1046_v52, 0.0 }
 0x149   :  { %v212_v57 = vrot.slane %v211_v54, 4  ;;  %v209_v61 = vrot.slane %v208_v53, 1  ;;  %v384_v29 = vpack.c.bf16 %v1033_v23, %v1033_v23  ;;  %v383_v30 = vpack.c.bf16 %v1030_v24, %v1030_v24 }
 0x14b   :  { %v213_v60 = vadd.f32 %v212_v57, %v211_v54  ;;  %v210_v63 = vadd.f32 %v209_v61, %v208_v53 }
 0x14d   :  { %v214_v62 = vrot.slane %v213_v60, 2  ;;  %1047 = vrcp.f32 %v210_v63 }
 0x14f   :  { %v215_v0 = vadd.f32 %v214_v62, %v213_v60 }
 0x151   :  { %v216_v1 = vrot.slane %v215_v0, 1 }
 0x153   :  { %v217_v2 = vadd.f32 %v216_v1, %v215_v0  ;;  %v1048_v3 = vpop.eup %1047 }
 0x154   :  { %v220_v6 = vmul.f32 %v1048_v3, %v1044_v44 }
 0x155   :  { %1049 = vrcp.f32 %v217_v2 }
 0x15b   :  { %v1050_v5 = vpop.eup %1049 }
 0x15c   :  { %v221_v7 = vmul.f32 %v1050_v5, %v1046_v52 }
 0x15e   :  { %v1013_v8 = vpack.i.bf16 %v221_v7, %v220_v6 }
 0x160   :  { %1014 = vxpose.xlu0.b32.start.end [1/1] (short) (narrow) %v1013_v8, 8 }
 0x168   :  { %1021 = vxpose.xlu0.b32.start.end [1/1] (short) (narrow) %v1020_v10, 8 }
 0x204   :  { %v1015_v18 = vpop.trf.xlu0 }
 0x205   :  { %v1019_v19 = vunpack.i.h.bf16 %v1015_v18  ;;  %v1016_v20 = vunpack.i.l.bf16 %v1015_v18 }
 0x207   :  { %v287_v21 = vpack.c.bf16 %v1019_v19, %v1019_v19  ;;  %v286_v22 = vpack.c.bf16 %v1016_v20, %v1016_v20 }
 0x209   :  { %v454_v25 = vunpack.c.l.b16 %v287_v21  ;;  %v453_v26 = vunpack.c.l.b16 %v286_v22 }
 0x20b   :  { %v456_v27 = vpack.c.b16 %v454_v25, %v454_v25  ;;  %v455_v28 = vpack.c.b16 %v453_v26, %v453_v26 }
 0x20c   :  { %v1022_v31 = vpop.trf.xlu0 }
 0x20d   :  { %v458_v32 = vrot.slane %v456_v27, 6  ;;  %v457_v33 = vrot.slane %v455_v28, 6  ;;  %v1026_v34 = vunpack.i.h.bf16 %v1022_v31  ;;  %v1023_v35 = vunpack.i.l.bf16 %v1022_v31 }
 0x20e   :  { %v613_v27 = vstv %s612_s27 }
 0x20f   :  { %v450_v36 = vpack.c.bf16 %v1026_v34, %v1026_v34  ;;  %v462_v37 = vsel %vm459_vm4, %v383_v30, %v457_v33  ;;  %v465_v38 = vsel %vm459_vm4, %v384_v29, %v458_v32  ;;  %v449_v39 = vpack.c.bf16 %v1023_v35, %v1023_v35 }
 0x210   :  { %947 = vmatmul.msk.bf16.vlgmr.msrb.gmra.mxu0 %vm470_vm5, %v462_v37  ;;  %948 = vmatmul.msk.bf16.vlgmr.msrb.gmra.mxu1 %vm470_vm5, %v465_v38 }
 0x211   :  { %v469_v40 = vsel %vm459_vm4, %v450_v36, %v458_v32  ;;  %v467_v41 = vsel %vm459_vm4, %v449_v39, %v457_v33  ;;  %v1117_v36 = vmov 0  }
 0x212   :  { %950 = vmatmul.msk.bf16.vlgmr.msra.gmra.mxu2 %vm470_vm5, %v469_v40  ;;  %949 = vmatmul.msk.bf16.vlgmr.msrb.gmra.mxu3 %vm470_vm5, %v467_v41 }
 0x213   :  { %1035 = vset.pattern.permute.xlu0 %v1117_v36  ;;  %1034 = vset.pattern.permute.xlu2 %v1117_v36 }
 0x28d   :  { %v1264_v44 = vpop.f32.mrf.mxu0  ;;  %v1266_v45 = vpop.f32.mrf.mxu1 }
 0x28e   :  { %v544_v46 = vpack.c.bf16 %v1266_v45, %v1264_v44 }
 0x290   :  { %968 = vmatmul.msk.bf16.vlgmr.msra.gmra.mxu1 %vm92_vm0, %v544_v46 }
 0x295   :  { %v488_v47 = vpop.f32.mrf.mxu0  ;;  %v506_v48 = vpop.f32.mrf.mxu1 }
 0x296   :  { %v1271_v49 = vpop.f32.mrf.mxu3  ;;  %v1273_v50 = vpop.f32.mrf.mxu2 }
 0x297   :  { %v549_v51 = vpack.c.bf16 %v1273_v50, %v1271_v49 }
 0x299   :  { %959 = vmatmul.msk.bf16.vlgmr.msra.gmra.mxu0 %vm92_vm0, %v549_v51 }
 0x29e   :  { %v524_v52 = vpop.f32.mrf.mxu3  ;;  %v542_v53 = vpop.f32.mrf.mxu2 }
 0x30d   :  { %v607_v54 = vpop.f32.mrf.mxu1 }
 0x315   :  { %v609_v60 = vpop.f32.mrf.mxu1 }
 0x316   :  { %v578_v55 = vpop.f32.mrf.mxu0 }
 0x317   :  { %v608_v57 = vadd.f32 %v607_v54, %v578_v55 }
 0x319   :  { %v656_v58 = vadd.f32 %v655_v56, %v608_v57  ;;  %v614_v31 = vadd.f32 %v613_v27, %v608_v57 }
 0x31b   :  { %v972_v59 = vmul.f32 -1.442695, %v656_v58  ;;  %v969_v33 = vmul.f32 -1.442695, %v614_v31 }
 0x31d   :  { %1051 = vpow2.f32 %v972_v59 }
 0x31e   :  { %v580_v61 = vpop.f32.mrf.mxu0 }
 0x31f   :  { %v610_v62 = vadd.f32 %v609_v60, %v580_v61 }
 0x321   :  { %v657_v63 = vadd.f32 %v655_v56, %v610_v62  ;;  %v615_v28 = vadd.f32 %v613_v27, %v610_v62 }
 0x323   :  { %v1052_v0 = vpop.eup %1051  ;;  %v973_v1 = vmul.f32 -1.442695, %v657_v63  ;;  %v970_v29 = vmul.f32 -1.442695, %v615_v28 }
 0x324   :  { %v664_v2 = vadd.f32 1.0, %v1052_v0 }
 0x326   :  { %1053 = vrcp.f32 %v664_v2  ;;  %v677_v8 = vand.u32 2147483648, %v664_v2  ;;  %v675_v10 = vand.u32 2147483647, %v664_v2  ;;  %vm671_vm7 = vweird.f32 %v664_v2 }
 0x327   :  { %1055 = vpow2.f32 %v973_v1 }
 0x328   :  { %v678_v12 = vor.u32 1.1754944e-38, %v677_v8  ;;  %vm676_vm9 = vcmp.eq.f32.partialorder %v675_v10, 8.507059e+37  ;;  %v1007_v8 = vld [vmem:[%s1322_s12 + $0x8] sm:$0xff]  ;;  %v1006_v10 = vld [vmem:[%s1322_s12] sm:$0xff] }
 0x329   :  { %831 = vmatpush.bf16.msra.mxu3 %v1007_v8 }
 0x32c   :  { %v1054_v3 = vpop.eup %1053 }
 0x32d   :  { %v1056_v4 = vpop.eup %1055  ;;  %v667_v5 = vmul.f32 %v1054_v3, %v664_v2  ;;  %vm672_vm6 = vweird.f32 %v1054_v3  ;;  %832 = vmatpush.bf16.msra.mxu3 %v1006_v10 }
 0x32e   :  { %v665_v6 = vadd.f32 1.0, %v1056_v4  ;;  %vm673_vm8 = vmor %vm671_vm7, %vm672_vm6  ;;  %vm746_vm7 = vcmask 257024  }
 0x32f   :  { %v668_v7 = vsub.f32 1.0, %v667_v5 }
 0x330   :  { %1057 = vrcp.f32 %v665_v6  ;;  %v692_v19 = vand.u32 2147483648, %v665_v6  ;;  %v690_v21 = vand.u32 2147483647, %v665_v6  ;;  %vm686_vm11 = vweird.f32 %v665_v6 }
 0x331   :  { %v669_v9 = vmul.f32 %v1054_v3, %v668_v7  ;;  %1059 = vpow2.f32 %v970_v29 }
 0x332   :  { %v693_v23 = vor.u32 1.1754944e-38, %v692_v19  ;;  %vm691_vm13 = vcmp.eq.f32.partialorder %v690_v21, 8.507059e+37 }
 0x333   :  { %v670_v11 = vadd.f32 %v1054_v3, %v669_v9  ;;  %v1005_v9 = vld [vmem:[%s1321_s11 + $0x8] sm:$0xff] }
 0x334   :  { %865 = vmatpush.bf16.msrb.mxu2 %v1005_v9 }
 0x335   :  { %v674_v13 = vsel %vm673_vm8, %v1054_v3, %v670_v11  ;;  %v1004_v11 = vld [vmem:[%s1321_s11] sm:$0xff]  ;;  %vm807_vm8 = vcmask 1041409  }
 0x336   :  { %v1058_v14 = vpop.eup %1057  ;;  %v679_v15 = vsel %vm676_vm9, %v678_v12, %v674_v13  ;;  %v738_v12 = vrot.slane %v1264_v44, 4  ;;  %v767_v13 = vrot.slane %v1271_v49, 4 }
 0x337   :  { %v698_v16 = vrot.slane %v679_v15, 4  ;;  %v682_v17 = vmul.f32 %v1058_v14, %v665_v6  ;;  %vm687_vm10 = vweird.f32 %v1058_v14  ;;  %v1060_v30 = vpop.eup %1059 }
 0x338   :  { %vm688_vm12 = vmor %vm686_vm11, %vm687_vm10  ;;  %v623_v32 = vadd.f32 1.0, %v1060_v30  ;;  %866 = vmatpush.bf16.msrb.mxu2 %v1004_v11  ;;  %v1038_v11 = vld [vmem:[%s1323_s13] ss:$0 sm:$0xff]  ;;  %s902_s13 = sshll.u32 %s1118_s5, 4  ;;  %s903_s13 = int_to_ptr.vmem [resolvable:$true] %s902_s13 }
 0x339   :  { %700 = vrot.lane.b32.xlu1 %v698_v16, %s1116_s9  ;;  %v683_v18 = vsub.f32 1.0, %v682_v17 }
 0x33a   :  { %1061 = vrcp.f32 %v623_v32  ;;  %v650_v43 = vand.u32 2147483648, %v623_v32  ;;  %vm644_vm15 = vweird.f32 %v623_v32  ;;  %v648_v46 = vand.u32 2147483647, %v623_v32 }
 0x33b   :  { %v684_v20 = vmul.f32 %v1058_v14, %v683_v18  ;;  %1063 = vpow2.f32 %v969_v33 }
 0x33c   :  { %v651_v51 = vor.u32 1.1754944e-38, %v650_v43  ;;  %vm649_vm2 = vcmp.eq.f32.partialorder %v648_v46, 8.507059e+37 }
 0x33d   :  { %v685_v22 = vadd.f32 %v1058_v14, %v684_v20 }
 0x33f   :  { %v689_v24 = vsel %vm688_vm12, %v1058_v14, %v685_v22 }
 0x340   :  { %v694_v25 = vsel %vm691_vm13, %v693_v23, %v689_v24  ;;  %v1062_v34 = vpop.eup %1061 }
 0x341   :  { %v699_v26 = vrot.slane %v694_v25, 4  ;;  %v1064_v35 = vpop.eup %1063  ;;  %v640_v37 = vmul.f32 %v1062_v34, %v623_v32  ;;  %vm645_vm14 = vweird.f32 %v1062_v34 }
 0x342   :  { %v622_v38 = vadd.f32 1.0, %v1064_v35  ;;  %vm646_vm1 = vmor %vm644_vm15, %vm645_vm14 }
 0x343   :  { %702 = vrot.lane.b32.xlu2 %v699_v26, %s1116_s9  ;;  %v641_v39 = vsub.f32 1.0, %v640_v37  ;;  %v739_v26 = vrot.slane %v1266_v45, 4 }
 0x344   :  { %1065 = vrcp.f32 %v622_v38  ;;  %v635_v58 = vand.u32 2147483648, %v622_v38  ;;  %vm629_vm4 = vweird.f32 %v622_v38  ;;  %v633_v60 = vand.u32 2147483647, %v622_v38 }
 0x345   :  { %v642_v40 = vmul.f32 %v1062_v34, %v641_v39 }
 0x346   :  { %v636_v63 = vor.u32 1.1754944e-38, %v635_v58  ;;  %vm634_vm6 = vcmp.eq.f32.partialorder %v633_v60, 8.507059e+37 }
 0x347   :  { %v643_v42 = vadd.f32 %v1062_v34, %v642_v40 }
 0x349   :  { %v647_v48 = vsel %vm646_vm1, %v1062_v34, %v643_v42 }
 0x34a   :  { %v1066_v41 = vpop.eup %1065  ;;  %v652_v54 = vsel %vm649_vm2, %v651_v51, %v647_v48 }
 0x34b   :  { %v625_v47 = vmul.f32 %v1066_v41, %v622_v38  ;;  %vm630_vm3 = vweird.f32 %v1066_v41 }
 0x34c   :  { %vm631_vm5 = vmor %vm629_vm4, %vm630_vm3 }
 0x34d   :  { %v626_v52 = vsub.f32 1.0, %v625_v47 }
 0x34f   :  { %v627_v56 = vmul.f32 %v1066_v41, %v626_v52 }
 0x351   :  { %v628_v57 = vadd.f32 %v1066_v41, %v627_v56 }
 0x353   :  { %v632_v62 = vsel %vm631_vm5, %v1066_v41, %v628_v57 }
 0x354   :  { %v637_v1 = vsel %vm634_vm6, %v636_v63, %v632_v62 }
 0x39d   :  { %v703_v53 = vpop.permute.xlu2 %702 }
 0x39e   :  { %v707_v55 = vadd.f32 %v703_v53, %v652_v54 }
 0x3a0   :  { %1067 = vrcp.f32 %v707_v55 }
 0x3a6   :  { %v1068_v59 = vpop.eup %1067 }
 0x3a7   :  { %v711_v61 = vmul.f32 %v1068_v59, %v652_v54 }
 0x3a9   :  { %721 = vperm.xlu0 %1035, %v711_v61   ;;  %v713_v6 = vsub.f32 1.0, %v711_v61 }
 0x3ab   :  { %v701_v0 = vpop.permute.xlu1 %700 }
 0x3ac   :  { %v706_v2 = vadd.f32 %v701_v0, %v637_v1 }
 0x3ae   :  { %1069 = vrcp.f32 %v706_v2 }
 0x3b4   :  { %v1070_v3 = vpop.eup %1069 }
 0x3b5   :  { %v710_v4 = vmul.f32 %v1070_v3, %v637_v1 }
 0x3b7   :  { %716 = vperm.xlu2 %1034, %v710_v4   ;;  %v712_v5 = vsub.f32 1.0, %v710_v4 }
 0x3bf   :  { %728 = vperm.xlu2 %1034, %v712_v5  }
 0x3c7   :  { %733 = vperm.xlu2 %1034, %v713_v6  }
 0x411   :  { %v717_v7 = vpop.permute.xlu2 %716 }
 0x412   :  { %v724_v15 = vmul.f32 %v717_v7, %v1264_v44  ;;  %v763_v16 = vmul.f32 %v717_v7, %v1271_v49  ;;  %v768_v44 = vrot.slane %v1273_v50, 4 }
 0x419   :  { %v729_v14 = vpop.permute.xlu2 %728 }
 0x41a   :  { %v742_v17 = vmul.f32 %v738_v12, %v729_v14  ;;  %v771_v18 = vmul.f32 %v767_v13, %v729_v14 }
 0x41b   :  { %v722_v25 = vpop.permute.xlu0 %721 }
 0x41c   :  { %v744_v19 = vadd.f32 %v742_v17, %v724_v15  ;;  %v773_v20 = vadd.f32 %v771_v18, %v763_v16  ;;  %v725_v29 = vmul.f32 %v722_v25, %v1266_v45  ;;  %v764_v30 = vmul.f32 %v722_v25, %v1273_v50 }
 0x41e   :  { %v747_v21 = vsel %vm746_vm7, %v744_v19, 0.0  ;;  %v775_v22 = vsel %vm746_vm7, %v773_v20, 0.0 }
 0x41f   :  { %v748_v23 = vrot.slane %v747_v21, 4  ;;  %v776_v24 = vrot.slane %v775_v22, 4 }
 0x421   :  { %v749_v27 = vadd.f32 %v748_v23, %v747_v21  ;;  %v777_v49 = vadd.f32 %v776_v24, %v775_v22  ;;  %v734_v28 = vpop.permute.xlu2 %733 }
 0x422   :  { %v743_v31 = vmul.f32 %v739_v26, %v734_v28  ;;  %v772_v32 = vmul.f32 %v768_v44, %v734_v28 }
 0x423   :  { %v750_v33 = vrot.slane %v749_v27, 2  ;;  %v778_v34 = vrot.slane %v777_v49, 2 }
 0x424   :  { %v745_v35 = vadd.f32 %v743_v31, %v725_v29  ;;  %v774_v36 = vadd.f32 %v772_v32, %v764_v30 }
 0x425   :  { %v751_v37 = vadd.f32 %v750_v33, %v749_v27  ;;  %v779_v38 = vadd.f32 %v778_v34, %v777_v49 }
 0x426   :  { %v754_v39 = vsel %vm746_vm7, %v745_v35, 0.0  ;;  %v782_v40 = vsel %vm746_vm7, %v774_v36, 0.0 }
 0x427   :  { %v752_v41 = vrot.slane %v751_v37, 1  ;;  %v780_v42 = vrot.slane %v779_v38, 1  ;;  %v755_v43 = vrot.slane %v754_v39, 4  ;;  %v783_v46 = vrot.slane %v782_v40, 4 }
 0x429   :  { %v756_v47 = vadd.f32 %v755_v43, %v754_v39  ;;  %v784_v45 = vadd.f32 %v783_v46, %v782_v40  ;;  %v753_v48 = vadd.f32 %v752_v41, %v751_v37  ;;  %v781_v50 = vadd.f32 %v780_v42, %v779_v38 }
 0x42b   :  { %v757_v51 = vrot.slane %v756_v47, 2  ;;  %v785_v52 = vrot.slane %v784_v45, 2  ;;  %v761_v55 = vmul.f32 0.25, %v753_v48  ;;  %v789_v56 = vmul.f32 0.25, %v781_v50 }
 0x42d   :  { %v758_v53 = vadd.f32 %v757_v51, %v756_v47  ;;  %v786_v54 = vadd.f32 %v785_v52, %v784_v45  ;;  %v791_v61 = vpack.c.bf16 %v761_v55, %v761_v55  ;;  %v797_v62 = vpack.c.bf16 %v789_v56, %v789_v56 }
 0x42f   :  { %v759_v57 = vrot.slane %v758_v53, 1  ;;  %v787_v58 = vrot.slane %v786_v54, 1  ;;  %v805_v3 = vunpack.c.l.b16 %v797_v62  ;;  %v840_v4 = vunpack.c.l.b16 %v791_v61 }
 0x431   :  { %v760_v59 = vadd.f32 %v759_v57, %v758_v53  ;;  %v788_v60 = vadd.f32 %v787_v58, %v786_v54 }
 0x433   :  { %v762_v63 = vmul.f32 0.25, %v760_v59  ;;  %v790_v0 = vmul.f32 0.25, %v788_v60 }
 0x435   :  { %v792_v1 = vpack.c.bf16 %v762_v63, %v762_v63  ;;  %v798_v2 = vpack.c.bf16 %v790_v0, %v790_v0 }
 0x437   :  { %v806_v5 = vunpack.c.l.b16 %v798_v2  ;;  %v841_v6 = vunpack.c.l.b16 %v792_v1 }
 0x439   :  { %v808_v7 = vsel %vm807_vm8, %v806_v5, %v805_v3  ;;  %v842_v8 = vsel %vm807_vm8, %v841_v6, %v840_v4 }
 0x43a   :  { %v809_v9 = vpack.c.b16 %v808_v7, %v808_v7  ;;  %v843_v10 = vpack.c.b16 %v842_v8, %v842_v8 }
 0x43c   :  { %982 = vmatmul.msk.bf16.vlgmr.msra.gmra.mxu3 %vm92_vm0, %v809_v9  ;;  %991 = vmatmul.msk.bf16.vlgmr.msrb.gmra.mxu2 %vm92_vm0, %v843_v10 }
 0x4bf   :  { %v834_v12 = vpop.f32.mrf.mxu3  ;;  %v868_v13 = vpop.f32.mrf.mxu2 }
 0x4c0   :  { %v869_v14 = vadd.f32 %v868_v13, %v834_v12 }
 0x4c2   :  { %v876_v15 = vadd.f32 %v1038_v11, %v869_v14 }
 0x4c4   :  { %v992_v16 = vmul.f32 -1.442695, %v876_v15 }
 0x4c6   :  { %1071 = vpow2.f32 %v992_v16 }
 0x4c7   :  { %v836_v17 = vpop.f32.mrf.mxu3  ;;  %v870_v18 = vpop.f32.mrf.mxu2 }
 0x4cc   :  { %v1072_v19 = vpop.eup %1071 }
 0x4cd   :  { %v880_v20 = vadd.f32 1.0, %v1072_v19 }
 0x4cf   :  { %1073 = vrcp.f32 %v880_v20  ;;  %v892_v24 = vand.u32 2147483648, %v880_v20  ;;  %v890_v26 = vand.u32 2147483647, %v880_v20  ;;  %vm886_vm9 = vweird.f32 %v880_v20 }
 0x4d1   :  { %v893_v27 = vor.u32 1.1754944e-38, %v892_v24  ;;  %vm891_vm11 = vcmp.eq.f32.partialorder %v890_v26, 8.507059e+37 }
 0x4d5   :  { %v1074_v21 = vpop.eup %1073 }
 0x4d6   :  { %v882_v22 = vmul.f32 %v1074_v21, %v880_v20  ;;  %vm887_vm0 = vweird.f32 %v1074_v21 }
 0x4d7   :  { %vm888_vm10 = vmor %vm886_vm9, %vm887_vm0 }
 0x4d8   :  { %v883_v23 = vsub.f32 1.0, %v882_v22 }
 0x4da   :  { %v884_v25 = vmul.f32 %v1074_v21, %v883_v23 }
 0x4dc   :  { %v885_v44 = vadd.f32 %v1074_v21, %v884_v25 }
 0x4de   :  { %v889_v49 = vsel %vm888_vm10, %v1074_v21, %v885_v44 }
 0x4df   :  { %v894_v28 = vsel %vm891_vm11, %v893_v27, %v889_v49 }
 0x4e0   :  { %896 = vst [vmem:[#allocation5] sm:$0x3] %v894_v28 }
 0x4e1   :  { %907 = dma.vmem_to_hbm [thread:$0]  %s903_s13, 32, %s905_s17, [#allocation3]  }
 0x4e2   :  { %1113 = dma.done.wait [#allocation3], 32  }
 0x4e3   :  { %1114 = vsyncadd [#allocation3], 4294967264 }
 0x4e4   :  { %912 = vsyncpa [#allocation3], 1 }
 0x4e5   :  { %913 = vsyncpa [#allocation4], 1 }

</bundles_post_ra>
